<compile_context>
chip_gen: v7x
topology: tpu7x:2x2x1
jax: 0.10.0
libtpu: 0.0.40
codegen_flags: <defaults>
</compile_context>

<pallas_src>
import functools

import jax
import jax.numpy as jnp
from jax.experimental import pallas as pl
from jax.experimental.pallas import tpu as pltpu


def _round_up(x, m):
    return (x + m - 1) // m * m


def _pad_to(x, shape, value=0.0):
    pads = [(0, t - s) for s, t in zip(x.shape, shape)]
    return jnp.pad(x, pads, constant_values=value)


# ----------------------------------------------------------------------------
# Pallas kernel: fused noun-attention + mixing + distribution + reconstruction.
# MXU operands are bf16; accumulation and all elementwise math are f32.
# Everything works in packed 2D layouts -- no in-kernel reshapes/relayouts.
# ----------------------------------------------------------------------------
def larn_kernel(
    n_noun,          # static: number of real noun positions
    noun_ref,        # (TB, P_in)     bf16  packed noun embeddings [l*d_word+i]
    query_ref,       # (TB, dh_p)     bf16  per-example (month) query
    st_ref,          # (TB, dw_p)     bf16  span-mean embedding
    w_noun_blk_ref,  # (P_in, P_hid)  bf16  block-diagonal noun projection
    b_noun_ref,      # (1, P_hid)     f32   tiled noun bias
    t_query_ref,     # (dh_p, P_hid)  bf16  0/1: tiles query across noun slots
    s_score_ref,     # (P_hid, Lsc)   bf16  0/1: per-noun chunk-sum for scores
    e_expand_ref,    # (Lsc, P_hid)   bf16  0/1: broadcasts attn over d_h chunk
    w_mix_nn_ref,    # (P_hid, dm_p)  bf16  w_mix_nn tiled over noun slots
    w_mix_st_ref,    # (dw_p, dm_p)   bf16
    b_mix_ref,       # (1, dm_p)      f32   includes folded entity contribution
    w_rel_ref,       # (dm_p, dd_p)   bf16
    b_rel_ref,       # (1, dd_p)      f32   (padded entries = -1e30)
    w_rec_ref,       # (dd_p, dw_p)   bf16
    b_rec_ref,       # (1, dw_p)      f32
    out_ref,         # out: (TB, dw_p + dd_p) f32  [recon | rels]
):
    f32 = jnp.float32
    bf16 = jnp.bfloat16

    tb = noun_ref.shape[0]
    lsc = s_score_ref.shape[1]
    dw_p = w_rec_ref.shape[1]

    # --- NounAttentionLayer_SingleQuery (packed layout) ----------------------
    # hidden[b, l*d_h + j] = tanh(noun[b, l, :] @ w_noun + b_noun)[j]
    hidden = jnp.tanh(
        jnp.dot(noun_ref[...], w_noun_blk_ref[...], preferred_element_type=f32)
        + b_noun_ref[...])                                   # (TB, P_hid) f32

    # q_tiled[b, l*d_h + j] = q[b, j]
    q_tiled = jnp.dot(query_ref[...], t_query_ref[...],
                      preferred_element_type=f32)            # (TB, P_hid) f32

    # scores[b, l] = sum_j hidden[b, l*d_h + j] * q[b, j]
    prod = (hidden * q_tiled).astype(bf16)
    scores = jnp.dot(prod, s_score_ref[...],
                     preferred_element_type=f32)             # (TB, Lsc) f32
    lane = jax.lax.broadcasted_iota(jnp.int32, (tb, lsc), 1)
    scores = jnp.where(lane < n_noun, scores, -1e30)
    scores = scores - jnp.max(scores, axis=-1, keepdims=True)
    p = jnp.exp(scores)
    attn = p * pl.reciprocal(jnp.sum(p, axis=-1, keepdims=True), approx=True)

    # noun_vec @ w_mix_nn  ==  (attn_expanded * hidden) @ w_mix_nn_tiled
    attn_exp = jnp.dot(attn.astype(bf16), e_expand_ref[...],
                       preferred_element_type=f32)           # (TB, P_hid) f32
    weighted = (attn_exp * hidden).astype(bf16)

    # --- MixingLayer (entity contribution pre-folded into b_mix) -------------
    mix_pre = (
        jnp.dot(st_ref[...], w_mix_st_ref[...], preferred_element_type=f32)
        + jnp.dot(weighted, w_mix_nn_ref[...], preferred_element_type=f32)
        + b_mix_ref[...])
    mix = jnp.maximum(mix_pre, 0.0).astype(bf16)             # (TB, dm_p)

    # --- DistributionLayer (softmax over d_desc; logits stay f32) ------------
    logits = jnp.dot(mix, w_rel_ref[...],
                     preferred_element_type=f32) + b_rel_ref[...]
    logits = logits - jnp.max(logits, axis=-1, keepdims=True)
    e = jnp.exp(logits)
    rels = e / jnp.sum(e, axis=-1, keepdims=True)            # exact reciprocal

    # --- l_recon --------------------------------------------------------------
    recon = jnp.dot(rels.astype(bf16), w_rec_ref[...],
                    preferred_element_type=f32) + b_rec_ref[...]

    out_ref[:, :dw_p] = recon.astype(out_ref.dtype)
    out_ref[:, dw_p:] = rels.astype(out_ref.dtype)


# ----------------------------------------------------------------------------
# One-time parameter preparation (padding / casting / packing) -- out of the
# per-call path.  All matmul weights are bf16, all biases f32.
# ----------------------------------------------------------------------------
def prepare_larn(params, n_noun, *, lane=128):
    f32, bf16 = jnp.float32, jnp.bfloat16
    We = params["We"]
    d_word = We.shape[1]
    d_h = params["w_noun"].shape[1]
    d_mix = params["b_mix"].shape[1]
    d_desc = params["b_rel"].shape[1]

    dw_p = _round_up(d_word, lane)
    dh_p = _round_up(d_h, lane)
    dm_p = _round_up(d_mix, lane)
    dd_p = _round_up(d_desc, lane)
    p_in = _round_up(n_noun * d_word, lane)   # packed noun width
    p_hid = _round_up(n_noun * d_h, lane)     # packed hidden width
    lsc = _round_up(n_noun, lane)             # score lanes

    eye_n = jnp.eye(n_noun, dtype=f32)
    w_noun_blk = jnp.kron(eye_n, params["w_noun"].astype(f32))      # block diag
    b_noun_tiled = jnp.tile(params["b_noun"].astype(f32), (1, n_noun))
    t_query = jnp.tile(jnp.eye(d_h, dtype=f32), (1, n_noun))        # (d_h, n*d_h)
    s_score = jnp.kron(eye_n, jnp.ones((d_h, 1), f32))              # (n*d_h, n)
    e_expand = jnp.kron(eye_n, jnp.ones((1, d_h), f32))             # (n, n*d_h)
    w_mix_nn_t = jnp.tile(params["w_mix_nn"].astype(f32), (n_noun, 1))

    return dict(
        n_noun=n_noun, d_word=d_word, d_h=d_h, d_desc=d_desc,
        dw_p=dw_p, dh_p=dh_p, dm_p=dm_p, dd_p=dd_p,
        p_in=p_in, p_hid=p_hid, lsc=lsc,
        # gather tables (pre-cast so gathers write bf16 bytes)
        We_bf16=We.astype(bf16),
        A_q=_pad_to(params["A"], (params["A"].shape[0], dh_p)).astype(bf16),
        # entity path (folded into bias per call, stays f32 / unpadded)
        ent_emb=params["ent_emb"].astype(f32),
        w_mix_e1=params["w_mix_e1"].astype(f32),
        w_mix_e2=params["w_mix_e2"].astype(f32),
        b_mix=params["b_mix"].astype(f32),
        # resident kernel operands
        w_noun_blk=_pad_to(w_noun_blk, (p_in, p_hid)).astype(bf16),
        b_noun_tiled=_pad_to(b_noun_tiled, (1, p_hid)).astype(f32),
        t_query=_pad_to(t_query, (dh_p, p_hid)).astype(bf16),
        s_score=_pad_to(s_score, (p_hid, lsc)).astype(bf16),
        e_expand=_pad_to(e_expand, (lsc, p_hid)).astype(bf16),
        w_mix_nn_t=_pad_to(w_mix_nn_t, (p_hid, dm_p)).astype(bf16),
        w_mix_st=_pad_to(params["w_mix_st"], (dw_p, dm_p)).astype(bf16),
        w_rel=_pad_to(params["w_rel"], (dm_p, dd_p)).astype(bf16),
        b_rel=_pad_to(params["b_rel"], (1, dd_p), value=-1e30).astype(f32),
        w_rec=_pad_to(params["w_rec"], (dd_p, dw_p)).astype(bf16),
        b_rec=_pad_to(params["b_rec"], (1, dw_p)).astype(f32),
    )


# ----------------------------------------------------------------------------
# Per-call wrapper: gathers + entity fold in XLA, hot path in the kernel.
# ----------------------------------------------------------------------------
def larn_forward(prep, spans, noun_spans, e1, e2, months, *, block_b=None):
    f32, bf16 = jnp.float32, jnp.bfloat16
    B = spans.shape[0]
    n_noun = prep["n_noun"]
    assert noun_spans.shape[1] == n_noun
    d_word, d_desc = prep["d_word"], prep["d_desc"]
    dw_p, dh_p, dm_p, dd_p = prep["dw_p"], prep["dh_p"], prep["dm_p"], prep["dd_p"]
    p_in, p_hid, lsc = prep["p_in"], prep["p_hid"], prep["lsc"]

    # Batch tile: >= 4 grid steps at small B (pipelining + both v7x TCs),
    # capped at 1024 rows (per-step footprint stays well under the 32 MiB
    # scoped-VMEM default even on v7x's 64 MiB VMEM).
    if block_b is None:
        block_b = min(1024, max(16, -(-B // 4)))
    TB = _round_up(min(block_b, max(B, 16)), 16)
    B_pad = _round_up(B, TB)
    grid = (B_pad // TB,)

    We = prep["We_bf16"]

    # Span mean (f32 accumulate over bf16 embeddings).
    st = jnp.mean(We[spans].astype(f32), axis=1)                   # (B, d_word)
    st = _pad_to(st, (B_pad, dw_p)).astype(bf16)

    # Lane-dense packed noun stream: (B_pad, n_noun*d_word) bf16, tail padded.
    noun = We[noun_spans]                                          # (B, n, d_word)
    noun = jnp.pad(noun, ((0, B_pad - B), (0, 0), (0, 0)))
    noun_packed = _pad_to(noun.reshape(B_pad, n_noun * d_word), (B_pad, p_in))

    query = _pad_to(prep["A_q"][months], (B_pad, dh_p))            # (B_pad, dh_p) bf16

    # Fold the batch-independent entity contribution into the mixing bias.
    ent1 = prep["ent_emb"][e1]
    ent2 = prep["ent_emb"][e2]
    b_mix_call = (prep["b_mix"]
                  + ent1 @ prep["w_mix_e1"] + ent2 @ prep["w_mix_e2"])
    b_mix_call = _pad_to(b_mix_call, (1, dm_p)).astype(f32)

    def stream(shape):
        return pl.BlockSpec(shape, lambda i: (i, 0))

    def resident(shape):
        nd = len(shape)
        return pl.BlockSpec(shape, lambda i: (0,) * nd,
                            pipeline_mode=pl.Buffered(1))   # single-buffered

    in_specs = [
        stream((TB, p_in)),        # noun_packed
        stream((TB, dh_p)),        # query
        stream((TB, dw_p)),        # st
        resident((p_in, p_hid)),   # w_noun_blk
        resident((1, p_hid)),      # b_noun_tiled
        resident((dh_p, p_hid)),   # t_query
        resident((p_hid, lsc)),    # s_score
        resident((lsc, p_hid)),    # e_expand
        resident((p_hid, dm_p)),   # w_mix_nn_t
        resident((dw_p, dm_p)),    # w_mix_st
        resident((1, dm_p)),       # b_mix (+entities)
        resident((dm_p, dd_p)),    # w_rel
        resident((1, dd_p)),       # b_rel
        resident((dd_p, dw_p)),    # w_rec
        resident((1, dw_p)),       # b_rec
    ]
    out_spec = pl.BlockSpec((TB, dw_p + dd_p), lambda i: (i, 0))
    out_shape = jax.ShapeDtypeStruct((B_pad, dw_p + dd_p), f32)

    out = pl.pallas_call(
        functools.partial(larn_kernel, n_noun),
        grid=grid,
        in_specs=in_specs,
        out_specs=out_spec,
        out_shape=out_shape,
        compiler_params=pltpu.CompilerParams(
            dimension_semantics=("parallel",)),
    )(
        noun_packed, query, st,
        prep["w_noun_blk"], prep["b_noun_tiled"],
        prep["t_query"], prep["s_score"], prep["e_expand"],
        prep["w_mix_nn_t"], prep["w_mix_st"], b_mix_call,
        prep["w_rel"], prep["b_rel"], prep["w_rec"], prep["b_rec"],
    )
    # Strip batch padding; split the fused output slab.
    recon = out[:B, :d_word]
    rels = out[:B, dw_p:dw_p + d_desc]
    return recon, rels


# ----------------------------------------------------------------------------
# Pure-JAX reference (f32, same math) for a sanity check.
# ----------------------------------------------------------------------------
def larn_reference(params, spans, noun_spans, e1, e2, months):
    We = params["We"]
    st = jnp.mean(We[spans], axis=1)
    noun_emb = We[noun_spans]
    q = params["A"][months]
    hidden = jnp.tanh(jnp.einsum("bld,dh->blh", noun_emb, params["w_noun"])
                      + params["b_noun"])
    attn = jax.nn.softmax(jnp.einsum("blh,bh->bl", hidden, q), axis=-1)
    noun_vec = jnp.einsum("bl,blh->bh", attn, hidden)
    e1_emb = params["ent_emb"][e1][None, :]
    e2_emb = params["ent_emb"][e2][None, :]
    mix = jax.nn.relu(st @ params["w_mix_st"] + noun_vec @ params["w_mix_nn"]
                      + e1_emb @ params["w_mix_e1"]
                      + e2_emb @ params["w_mix_e2"] + params["b_mix"])
    rels = jax.nn.softmax(mix @ params["w_rel"] + params["b_rel"], axis=-1)
    recon = rels @ params["w_rec"] + params["b_rec"]
    return recon, rels


# ----------------------------------------------------------------------------
def make_params(key, vocab, d_word, d_noun_hidden, d_ent, d_mix, d_desc,
                n_ent, n_meta):
    ks = jax.random.split(key, 12)

    def xavier(k, shape):
        fan_in, fan_out = shape[0], shape[-1]
        lim = jnp.sqrt(6.0 / (fan_in + fan_out))
        return jax.random.uniform(k, shape, jnp.float32, -lim, lim)

    return dict(
        We=jax.random.normal(ks[0], (vocab, d_word), jnp.float32) * 0.1,
        A=jax.random.normal(ks[1], (n_meta, d_noun_hidden), jnp.float32) * 0.1,
        ent_emb=jax.random.normal(ks[2], (n_ent, d_ent), jnp.float32) * 0.1,
        w_noun=xavier(ks[3], (d_word, d_noun_hidden)),
        b_noun=jnp.zeros((1, d_noun_hidden), jnp.float32),
        w_mix_st=xavier(ks[4], (d_word, d_mix)),
        w_mix_nn=xavier(ks[5], (d_noun_hidden, d_mix)),
        w_mix_e1=xavier(ks[6], (d_ent, d_mix)),
        w_mix_e2=xavier(ks[7], (d_ent, d_mix)),
        b_mix=jnp.zeros((1, d_mix), jnp.float32),
        w_rel=xavier(ks[8], (d_mix, d_desc)),
        b_rel=jnp.zeros((1, d_desc), jnp.float32),
        w_rec=xavier(ks[9], (d_desc, d_word)),
        b_rec=jnp.zeros((1, d_word), jnp.float32),
    )


if __name__ == "__main__":
    # Small deterministic sizes consistent with the module's constructor.
    vocab, d_word, d_noun_hidden, d_ent = 50, 32, 32, 16
    d_meta, d_mix, d_desc, n_ent, n_meta = 8, 32, 16, 10, 12
    B, L_span, L_noun = 64, 6, 5

    key = jax.random.PRNGKey(0)
    kp, k1, k2, k3 = jax.random.split(key, 4)
    params = make_params(kp, vocab, d_word, d_noun_hidden, d_ent,
                         d_mix, d_desc, n_ent, n_meta)
    prep = prepare_larn(params, L_noun)   # one-time pad / cast / pack

    spans = jax.random.randint(k1, (B, L_span), 0, vocab)
    noun_spans = jax.random.randint(k2, (B, L_noun), 0, vocab)
    months = jax.random.randint(k3, (B,), 0, n_meta)
    e1, e2 = jnp.int32(3), jnp.int32(7)

    fwd = jax.jit(functools.partial(larn_forward, prep))
    recon, rels = fwd(spans, noun_spans, e1, e2, months)
    jax.block_until_ready((recon, rels))

    recon_ref, rels_ref = larn_reference(params, spans, noun_spans, e1, e2,
                                         months)
    assert recon.shape == (B, d_word) and rels.shape == (B, d_desc)
    # bf16 MXU operands + approx reciprocal (attention only) => relaxed tol.
    assert jnp.allclose(rels, rels_ref, atol=2e-2, rtol=2e-2), (
        float(jnp.max(jnp.abs(rels - rels_ref))))
    assert jnp.allclose(recon, recon_ref, atol=2e-2, rtol=2e-2), (
        float(jnp.max(jnp.abs(recon - recon_ref))))
    assert bool(jnp.all(jnp.isfinite(recon))) and bool(jnp.all(jnp.isfinite(rels)))

    print("KERNEL_OK")
</pallas_src>

<mosaic_0001>
module attributes {stable_mosaic.version = 11 : i64} {
  func.func @larn_kernel(%arg0: i32, %arg1: memref<16x256xbf16, #tpu.memory_space<vmem>>, %arg2: memref<16x128xbf16, #tpu.memory_space<vmem>>, %arg3: memref<16x128xbf16, #tpu.memory_space<vmem>>, %arg4: memref<256x256xbf16, #tpu.memory_space<vmem>>, %arg5: memref<1x256xf32, #tpu.memory_space<vmem>>, %arg6: memref<128x256xbf16, #tpu.memory_space<vmem>>, %arg7: memref<256x128xbf16, #tpu.memory_space<vmem>>, %arg8: memref<128x256xbf16, #tpu.memory_space<vmem>>, %arg9: memref<256x128xbf16, #tpu.memory_space<vmem>>, %arg10: memref<128x128xbf16, #tpu.memory_space<vmem>>, %arg11: memref<1x128xf32, #tpu.memory_space<vmem>>, %arg12: memref<128x128xbf16, #tpu.memory_space<vmem>>, %arg13: memref<1x128xf32, #tpu.memory_space<vmem>>, %arg14: memref<128x128xbf16, #tpu.memory_space<vmem>>, %arg15: memref<1x128xf32, #tpu.memory_space<vmem>>, %arg16: memref<16x256xf32, #tpu.memory_space<vmem>>) attributes {dimension_semantics = [#tpu.dimension_semantics<parallel>], iteration_bounds = array<i64: 4>, scalar_prefetch = 0 : i64, scratch_operands = 0 : i64, tpu.core_type = #tpu.core_type<tc>, window_params = [{transform_indices = @transform_0, window_bounds = array<i64: 16, 256>}, {transform_indices = @transform_1, window_bounds = array<i64: 16, 128>}, {transform_indices = @transform_2, window_bounds = array<i64: 16, 128>}, {pipeline_mode = #tpu.pipeline_mode<synchronous>, transform_indices = @transform_3, window_bounds = array<i64: 256, 256>}, {pipeline_mode = #tpu.pipeline_mode<synchronous>, transform_indices = @transform_4, window_bounds = array<i64: 1, 256>}, {pipeline_mode = #tpu.pipeline_mode<synchronous>, transform_indices = @transform_5, window_bounds = array<i64: 128, 256>}, {pipeline_mode = #tpu.pipeline_mode<synchronous>, transform_indices = @transform_6, window_bounds = array<i64: 256, 128>}, {pipeline_mode = #tpu.pipeline_mode<synchronous>, transform_indices = @transform_7, window_bounds = array<i64: 128, 256>}, {pipeline_mode = #tpu.pipeline_mode<synchronous>, transform_indices = @transform_8, window_bounds = array<i64: 256, 128>}, {pipeline_mode = #tpu.pipeline_mode<synchronous>, transform_indices = @transform_9, window_bounds = array<i64: 128, 128>}, {pipeline_mode = #tpu.pipeline_mode<synchronous>, transform_indices = @transform_10, window_bounds = array<i64: 1, 128>}, {pipeline_mode = #tpu.pipeline_mode<synchronous>, transform_indices = @transform_11, window_bounds = array<i64: 128, 128>}, {pipeline_mode = #tpu.pipeline_mode<synchronous>, transform_indices = @transform_12, window_bounds = array<i64: 1, 128>}, {pipeline_mode = #tpu.pipeline_mode<synchronous>, transform_indices = @transform_13, window_bounds = array<i64: 128, 128>}, {pipeline_mode = #tpu.pipeline_mode<synchronous>, transform_indices = @transform_14, window_bounds = array<i64: 1, 128>}, {transform_indices = @transform_15, window_bounds = array<i64: 16, 256>}]} {
    %c0 = arith.constant 0 : index
    %c0_0 = arith.constant 0 : index
    %0 = vector.load %arg1[%c0, %c0_0] : memref<16x256xbf16, #tpu.memory_space<vmem>>, vector<16x256xbf16>
    %c0_1 = arith.constant 0 : index
    %c0_2 = arith.constant 0 : index
    %1 = vector.load %arg4[%c0_1, %c0_2] : memref<256x256xbf16, #tpu.memory_space<vmem>>, vector<256x256xbf16>
    %cst = arith.constant dense<0.000000e+00> : vector<16x256xf32>
    %2 = tpu.matmul %0, %1, %cst {dimension_numbers = #tpu.dot_dimension_numbers<[1], [0], [0], [1], [0, 0, 1, 1], [], []>} : vector<16x256xbf16>, vector<256x256xbf16>, vector<16x256xf32> -> vector<16x256xf32>
    %c0_3 = arith.constant 0 : index
    %c0_4 = arith.constant 0 : index
    %3 = vector.load %arg5[%c0_3, %c0_4] : memref<1x256xf32, #tpu.memory_space<vmem>>, vector<1x256xf32>
    %4 = vector.broadcast %3 : vector<1x256xf32> to vector<16x256xf32>
    %5 = arith.addf %2, %4 : vector<16x256xf32>
    %6 = math.tanh %5 : vector<16x256xf32>
    %c0_5 = arith.constant 0 : index
    %c0_6 = arith.constant 0 : index
    %7 = vector.load %arg2[%c0_5, %c0_6] : memref<16x128xbf16, #tpu.memory_space<vmem>>, vector<16x128xbf16>
    %c0_7 = arith.constant 0 : index
    %c0_8 = arith.constant 0 : index
    %8 = vector.load %arg6[%c0_7, %c0_8] : memref<128x256xbf16, #tpu.memory_space<vmem>>, vector<128x256xbf16>
    %cst_9 = arith.constant dense<0.000000e+00> : vector<16x256xf32>
    %9 = tpu.matmul %7, %8, %cst_9 {dimension_numbers = #tpu.dot_dimension_numbers<[1], [0], [0], [1], [0, 0, 1, 1], [], []>} : vector<16x128xbf16>, vector<128x256xbf16>, vector<16x256xf32> -> vector<16x256xf32>
    %10 = arith.mulf %6, %9 : vector<16x256xf32>
    %11 = arith.truncf %10 : vector<16x256xf32> to vector<16x256xbf16>
    %c0_10 = arith.constant 0 : index
    %c0_11 = arith.constant 0 : index
    %12 = vector.load %arg7[%c0_10, %c0_11] : memref<256x128xbf16, #tpu.memory_space<vmem>>, vector<256x128xbf16>
    %cst_12 = arith.constant dense<0.000000e+00> : vector<16x128xf32>
    %13 = tpu.matmul %11, %12, %cst_12 {dimension_numbers = #tpu.dot_dimension_numbers<[1], [0], [0], [1], [0, 0, 1, 1], [], []>} : vector<16x256xbf16>, vector<256x128xbf16>, vector<16x128xf32> -> vector<16x128xf32>
    %14 = tpu.iota {dimensions = array<i32: 1>} : vector<16x128xi32>
    %c5_i32 = arith.constant 5 : i32
    %15 = vector.broadcast %c5_i32 : i32 to vector<16x128xi32>
    %16 = arith.cmpi slt, %14, %15 : vector<16x128xi32>
    %cst_13 = arith.constant -1.000000e+30 : f32
    %17 = vector.broadcast %cst_13 : f32 to vector<16x128xf32>
    %18 = arith.select %16, %13, %17 : vector<16x128xi1>, vector<16x128xf32>
    %cst_14 = arith.constant dense<0xFF800000> : vector<16xf32>
    %19 = vector.multi_reduction <maximumf>, %18, %cst_14 [1] : vector<16x128xf32> to vector<16xf32>
    %20 = vector.shape_cast %19 : vector<16xf32> to vector<16x1xf32>
    %21 = vector.broadcast %20 : vector<16x1xf32> to vector<16x128xf32>
    %22 = arith.subf %18, %21 : vector<16x128xf32>
    %23 = math.exp %22 : vector<16x128xf32>
    %cst_15 = arith.constant dense<0.000000e+00> : vector<16xf32>
    %24 = vector.multi_reduction <add>, %23, %cst_15 [1] : vector<16x128xf32> to vector<16xf32>
    %25 = vector.shape_cast %24 : vector<16xf32> to vector<16x1xf32>
    %26 = tpu.reciprocal %25 {approx = true} : vector<16x1xf32> -> vector<16x1xf32>
    %27 = vector.broadcast %26 : vector<16x1xf32> to vector<16x128xf32>
    %28 = arith.mulf %23, %27 : vector<16x128xf32>
    %29 = arith.truncf %28 : vector<16x128xf32> to vector<16x128xbf16>
    %c0_16 = arith.constant 0 : index
    %c0_17 = arith.constant 0 : index
    %30 = vector.load %arg8[%c0_16, %c0_17] : memref<128x256xbf16, #tpu.memory_space<vmem>>, vector<128x256xbf16>
    %cst_18 = arith.constant dense<0.000000e+00> : vector<16x256xf32>
    %31 = tpu.matmul %29, %30, %cst_18 {dimension_numbers = #tpu.dot_dimension_numbers<[1], [0], [0], [1], [0, 0, 1, 1], [], []>} : vector<16x128xbf16>, vector<128x256xbf16>, vector<16x256xf32> -> vector<16x256xf32>
    %32 = arith.mulf %31, %6 : vector<16x256xf32>
    %33 = arith.truncf %32 : vector<16x256xf32> to vector<16x256xbf16>
    %c0_19 = arith.constant 0 : index
    %c0_20 = arith.constant 0 : index
    %34 = vector.load %arg3[%c0_19, %c0_20] : memref<16x128xbf16, #tpu.memory_space<vmem>>, vector<16x128xbf16>
    %c0_21 = arith.constant 0 : index
    %c0_22 = arith.constant 0 : index
    %35 = vector.load %arg10[%c0_21, %c0_22] : memref<128x128xbf16, #tpu.memory_space<vmem>>, vector<128x128xbf16>
    %cst_23 = arith.constant dense<0.000000e+00> : vector<16x128xf32>
    %36 = tpu.matmul %34, %35, %cst_23 {dimension_numbers = #tpu.dot_dimension_numbers<[1], [0], [0], [1], [0, 0, 1, 1], [], []>} : vector<16x128xbf16>, vector<128x128xbf16>, vector<16x128xf32> -> vector<16x128xf32>
    %c0_24 = arith.constant 0 : index
    %c0_25 = arith.constant 0 : index
    %37 = vector.load %arg9[%c0_24, %c0_25] : memref<256x128xbf16, #tpu.memory_space<vmem>>, vector<256x128xbf16>
    %cst_26 = arith.constant dense<0.000000e+00> : vector<16x128xf32>
    %38 = tpu.matmul %33, %37, %cst_26 {dimension_numbers = #tpu.dot_dimension_numbers<[1], [0], [0], [1], [0, 0, 1, 1], [], []>} : vector<16x256xbf16>, vector<256x128xbf16>, vector<16x128xf32> -> vector<16x128xf32>
    %39 = arith.addf %36, %38 : vector<16x128xf32>
    %c0_27 = arith.constant 0 : index
    %c0_28 = arith.constant 0 : index
    %40 = vector.load %arg11[%c0_27, %c0_28] : memref<1x128xf32, #tpu.memory_space<vmem>>, vector<1x128xf32>
    %41 = vector.broadcast %40 : vector<1x128xf32> to vector<16x128xf32>
    %42 = arith.addf %39, %41 : vector<16x128xf32>
    %cst_29 = arith.constant 0.000000e+00 : f32
    %43 = vector.broadcast %cst_29 : f32 to vector<16x128xf32>
    %44 = arith.maximumf %42, %43 : vector<16x128xf32>
    %45 = arith.truncf %44 : vector<16x128xf32> to vector<16x128xbf16>
    %c0_30 = arith.constant 0 : index
    %c0_31 = arith.constant 0 : index
    %46 = vector.load %arg12[%c0_30, %c0_31] : memref<128x128xbf16, #tpu.memory_space<vmem>>, vector<128x128xbf16>
    %cst_32 = arith.constant dense<0.000000e+00> : vector<16x128xf32>
    %47 = tpu.matmul %45, %46, %cst_32 {dimension_numbers = #tpu.dot_dimension_numbers<[1], [0], [0], [1], [0, 0, 1, 1], [], []>} : vector<16x128xbf16>, vector<128x128xbf16>, vector<16x128xf32> -> vector<16x128xf32>
    %c0_33 = arith.constant 0 : index
    %c0_34 = arith.constant 0 : index
    %48 = vector.load %arg13[%c0_33, %c0_34] : memref<1x128xf32, #tpu.memory_space<vmem>>, vector<1x128xf32>
    %49 = vector.broadcast %48 : vector<1x128xf32> to vector<16x128xf32>
    %50 = arith.addf %47, %49 : vector<16x128xf32>
    %cst_35 = arith.constant dense<0xFF800000> : vector<16xf32>
    %51 = vector.multi_reduction <maximumf>, %50, %cst_35 [1] : vector<16x128xf32> to vector<16xf32>
    %52 = vector.shape_cast %51 : vector<16xf32> to vector<16x1xf32>
    %53 = vector.broadcast %52 : vector<16x1xf32> to vector<16x128xf32>
    %54 = arith.subf %50, %53 : vector<16x128xf32>
    %55 = math.exp %54 : vector<16x128xf32>
    %cst_36 = arith.constant dense<0.000000e+00> : vector<16xf32>
    %56 = vector.multi_reduction <add>, %55, %cst_36 [1] : vector<16x128xf32> to vector<16xf32>
    %57 = vector.shape_cast %56 : vector<16xf32> to vector<16x1xf32>
    %58 = vector.broadcast %57 : vector<16x1xf32> to vector<16x128xf32>
    %59 = arith.divf %55, %58 : vector<16x128xf32>
    %60 = arith.truncf %59 : vector<16x128xf32> to vector<16x128xbf16>
    %c0_37 = arith.constant 0 : index
    %c0_38 = arith.constant 0 : index
    %61 = vector.load %arg14[%c0_37, %c0_38] : memref<128x128xbf16, #tpu.memory_space<vmem>>, vector<128x128xbf16>
    %cst_39 = arith.constant dense<0.000000e+00> : vector<16x128xf32>
    %62 = tpu.matmul %60, %61, %cst_39 {dimension_numbers = #tpu.dot_dimension_numbers<[1], [0], [0], [1], [0, 0, 1, 1], [], []>} : vector<16x128xbf16>, vector<128x128xbf16>, vector<16x128xf32> -> vector<16x128xf32>
    %c0_40 = arith.constant 0 : index
    %c0_41 = arith.constant 0 : index
    %63 = vector.load %arg15[%c0_40, %c0_41] : memref<1x128xf32, #tpu.memory_space<vmem>>, vector<1x128xf32>
    %64 = vector.broadcast %63 : vector<1x128xf32> to vector<16x128xf32>
    %65 = arith.addf %62, %64 : vector<16x128xf32>
    %c0_42 = arith.constant 0 : index
    %c0_43 = arith.constant 0 : index
    %66 = vector.load %arg16[%c0_42, %c0_43] : memref<16x256xf32, #tpu.memory_space<vmem>>, vector<16x128xf32>
    tpu.vector_store %arg16[%c0_42, %c0_43], %65 {strides = array<i32>} : memref<16x256xf32, #tpu.memory_space<vmem>>, vector<16x128xf32>,
    %c0_44 = arith.constant 0 : index
    %c128 = arith.constant 128 : index
    %67 = vector.load %arg16[%c0_44, %c128] : memref<16x256xf32, #tpu.memory_space<vmem>>, vector<16x128xf32>
    tpu.vector_store %arg16[%c0_44, %c128], %59 {strides = array<i32>} : memref<16x256xf32, #tpu.memory_space<vmem>>, vector<16x128xf32>,
    return
  }
  func.func @transform_0(%arg0: i32) -> (i32, i32) {
    %c0_i32 = arith.constant 0 : i32
    %c0_i32_0 = arith.constant 0 : i32
    return %arg0, %c0_i32 : i32, i32
  }
  func.func @transform_1(%arg0: i32) -> (i32, i32) {
    %c0_i32 = arith.constant 0 : i32
    %c0_i32_0 = arith.constant 0 : i32
    return %arg0, %c0_i32 : i32, i32
  }
  func.func @transform_2(%arg0: i32) -> (i32, i32) {
    %c0_i32 = arith.constant 0 : i32
    %c0_i32_0 = arith.constant 0 : i32
    return %arg0, %c0_i32 : i32, i32
  }
  func.func @transform_3(%arg0: i32) -> (i32, i32) {
    %c0_i32 = arith.constant 0 : i32
    %c0_i32_0 = arith.constant 0 : i32
    %c0_i32_1 = arith.constant 0 : i32
    return %c0_i32, %c0_i32_0 : i32, i32
  }
  func.func @transform_4(%arg0: i32) -> (i32, i32) {
    %c0_i32 = arith.constant 0 : i32
    %c0_i32_0 = arith.constant 0 : i32
    %c0_i32_1 = arith.constant 0 : i32
    return %c0_i32, %c0_i32_0 : i32, i32
  }
  func.func @transform_5(%arg0: i32) -> (i32, i32) {
    %c0_i32 = arith.constant 0 : i32
    %c0_i32_0 = arith.constant 0 : i32
    %c0_i32_1 = arith.constant 0 : i32
    return %c0_i32, %c0_i32_0 : i32, i32
  }
  func.func @transform_6(%arg0: i32) -> (i32, i32) {
    %c0_i32 = arith.constant 0 : i32
    %c0_i32_0 = arith.constant 0 : i32
    %c0_i32_1 = arith.constant 0 : i32
    return %c0_i32, %c0_i32_0 : i32, i32
  }
  func.func @transform_7(%arg0: i32) -> (i32, i32) {
    %c0_i32 = arith.constant 0 : i32
    %c0_i32_0 = arith.constant 0 : i32
    %c0_i32_1 = arith.constant 0 : i32
    return %c0_i32, %c0_i32_0 : i32, i32
  }
  func.func @transform_8(%arg0: i32) -> (i32, i32) {
    %c0_i32 = arith.constant 0 : i32
    %c0_i32_0 = arith.constant 0 : i32
    %c0_i32_1 = arith.constant 0 : i32
    return %c0_i32, %c0_i32_0 : i32, i32
  }
  func.func @transform_9(%arg0: i32) -> (i32, i32) {
    %c0_i32 = arith.constant 0 : i32
    %c0_i32_0 = arith.constant 0 : i32
    %c0_i32_1 = arith.constant 0 : i32
    return %c0_i32, %c0_i32_0 : i32, i32
  }
  func.func @transform_10(%arg0: i32) -> (i32, i32) {
    %c0_i32 = arith.constant 0 : i32
    %c0_i32_0 = arith.constant 0 : i32
    %c0_i32_1 = arith.constant 0 : i32
    return %c0_i32, %c0_i32_0 : i32, i32
  }
  func.func @transform_11(%arg0: i32) -> (i32, i32) {
    %c0_i32 = arith.constant 0 : i32
    %c0_i32_0 = arith.constant 0 : i32
    %c0_i32_1 = arith.constant 0 : i32
    return %c0_i32, %c0_i32_0 : i32, i32
  }
  func.func @transform_12(%arg0: i32) -> (i32, i32) {
    %c0_i32 = arith.constant 0 : i32
    %c0_i32_0 = arith.constant 0 : i32
    %c0_i32_1 = arith.constant 0 : i32
    return %c0_i32, %c0_i32_0 : i32, i32
  }
  func.func @transform_13(%arg0: i32) -> (i32, i32) {
    %c0_i32 = arith.constant 0 : i32
    %c0_i32_0 = arith.constant 0 : i32
    %c0_i32_1 = arith.constant 0 : i32
    return %c0_i32, %c0_i32_0 : i32, i32
  }
  func.func @transform_14(%arg0: i32) -> (i32, i32) {
    %c0_i32 = arith.constant 0 : i32
    %c0_i32_0 = arith.constant 0 : i32
    %c0_i32_1 = arith.constant 0 : i32
    return %c0_i32, %c0_i32_0 : i32, i32
  }
  func.func @transform_15(%arg0: i32) -> (i32, i32) {
    %c0_i32 = arith.constant 0 : i32
    %c0_i32_0 = arith.constant 0 : i32
    return %arg0, %c0_i32 : i32, i32
  }
}

</mosaic_0001>

<bundles_post_ra>
// kernel: larn_forward.1
= control target key start
LH: loop header
LB: loop body
LE: loop exit
PB: predicated region body
PF: predicated region fallthrough
CT: control target
= control target key end

     0   :  { %s2485_s18 = smov 0   ;;  %s2944_s0 = inlined_call_operand.vmem [shape: bf16[64,256], index: 0, kind: input, shape index: {}]   ;;  %s2945_s1 = inlined_call_operand.vmem [shape: bf16[64,128], index: 1, kind: input, shape index: {}]   ;;  %s2946_s2 = inlined_call_operand.vmem [shape: bf16[64,128], index: 2, kind: input, shape index: {}]   ;;  %s2947_s3 = inlined_call_operand.vmem [shape: bf16[256,256], index: 3, kind: input, shape index: {}]   ;;  %s2948_s4 = inlined_call_operand.vmem [shape: f32[1,256], index: 4, kind: input, shape index: {}]   ;;  %s2949_s5 = inlined_call_operand.vmem [shape: bf16[128,256], index: 5, kind: input, shape index: {}]   ;;  %s2950_s6 = inlined_call_operand.vmem [shape: bf16[256,128], index: 6, kind: input, shape index: {}]   ;;  %s2951_s7 = inlined_call_operand.vmem [shape: bf16[128,256], index: 7, kind: input, shape index: {}]   ;;  %s2952_s8 = inlined_call_operand.vmem [shape: bf16[256,128], index: 8, kind: input, shape index: {}]   ;;  %s2953_s9 = inlined_call_operand.vmem [shape: bf16[128,128], index: 9, kind: input, shape index: {}]   ;;  %s2954_s10 = inlined_call_operand.vmem [shape: f32[1,128], index: 10, kind: input, shape index: {}]   ;;  %s2955_s11 = inlined_call_operand.vmem [shape: bf16[128,128], index: 11, kind: input, shape index: {}]   ;;  %s2956_s12 = inlined_call_operand.vmem [shape: f32[1,128], index: 12, kind: input, shape index: {}]   ;;  %s2957_s13 = inlined_call_operand.vmem [shape: bf16[128,128], index: 13, kind: input, shape index: {}]   ;;  %s2958_s14 = inlined_call_operand.vmem [shape: f32[1,128], index: 14, kind: input, shape index: {}]   ;;  %s2959_s15 = inlined_call_operand.vmem [shape: f32[64,256], index: 15, kind: output, shape index: {}]  }
   0x1 LB: > { %s1925_s19 = sadd.s32 4294967295, %s2400_s18   ;;  %p1929_p0 = scmp.ge.s32.totalorder %s2400_s18, 1  ;;  %s2400_s18 = sphi %s2485_s18, %s25_s18  }
   0x2   : > { %p461_p1 = scmp.lt.s32.totalorder %s2400_s18, 5 }
   0x4   : > { %p462_p2 = pnand %p1929_p0, %p461_p1 }
   0x5   : > { %v2213_v0 = vld [vmem:[%s2947_s3 + $0x4] ss:$8 sps:$4 sm:$0xff] (!%p462_p2)   ;;  %v2215_v1 = vld [vmem:[%s2947_s3] ss:$8 sps:$4 sm:$0xff] (!%p462_p2)   ;;  %v2402_v2 = vmov (!%p462_p2), 0   ;;  %s1930_s25 = sshll.u32 (!%p462_p2), %s1925_s19, 1 }
   0x6   : > { %465 = sbr.rel (%p462_p2) target bundleno = 2029 (0x7ed), region = 80  ;;  %947 = vmatprep.mubr.bf16.mxu1 (!%p462_p2), %v2402_v2  ;;  %764 = vmatprep.subr.bf16.mxu0 (!%p462_p2), %v2213_v0  ;;  %v2216_v3 = vld [vmem:[%s2947_s3 + $0x14] ss:$8 sps:$4 sm:$0xff] (!%p462_p2)   ;;  %v2218_v4 = vld [vmem:[%s2947_s3 + $0x10] ss:$8 sps:$4 sm:$0xff] (!%p462_p2)   ;;  %p522_p3 = scmp.lt.s32.totalorder (!%p462_p2), %s1930_s25, 7 }
   0x7   : > { %765 = vmatpush1.bf16.msra.mxu0 (!%p462_p2), %v2215_v1  ;;  %v2219_v5 = vld [vmem:[%s2947_s3 + $0x24] ss:$8 sps:$4 sm:$0xff] (!%p462_p2)   ;;  %v2221_v6 = vld [vmem:[%s2947_s3 + $0x20] ss:$8 sps:$4 sm:$0xff] (!%p462_p2)   ;;  %v2222_v7 = vld [vmem:[%s2947_s3 + $0x34] ss:$8 sps:$4 sm:$0xff] (!%p462_p2)  }
   0x8   : > { %766 = vmatprep.subr.bf16.mxu0 (!%p462_p2), %v2216_v3  ;;  %v2224_v8 = vld [vmem:[%s2947_s3 + $0x30] ss:$8 sps:$4 sm:$0xff] (!%p462_p2)   ;;  %v2225_v9 = vld [vmem:[%s2947_s3 + $0x44] ss:$8 sps:$4 sm:$0xff] (!%p462_p2)   ;;  %v2227_v10 = vld [vmem:[%s2947_s3 + $0x40] ss:$8 sps:$4 sm:$0xff] (!%p462_p2)  }
   0x9   : > { %v2246_v11 = vld [vmem:[%s2949_s5 + $0x4] ss:$8 sps:$4 sm:$0xff] (!%p462_p2)   ;;  %v2248_v12 = vld [vmem:[%s2949_s5] ss:$8 sps:$4 sm:$0xff] (!%p462_p2)   ;;  %v2228_v13 = vld [vmem:[%s2947_s3 + $0x54] ss:$8 sps:$4 sm:$0xff] (!%p462_p2)  }
   0xa   : > { %915 = vmatprep.subr.bf16.mxu1 (!%p462_p2), %v2246_v11  ;;  %v2252_v14 = vld [vmem:[%s2949_s5 + $0x14] ss:$8 sps:$4 sm:$0xff] (!%p462_p2)   ;;  %v2254_v15 = vld [vmem:[%s2949_s5 + $0x10] ss:$8 sps:$4 sm:$0xff] (!%p462_p2)   ;;  %v2231_v17 = vld [vmem:[%s2947_s3 + $0x64] ss:$8 sps:$4 sm:$0xff] (!%p462_p2)  }
   0xb   : > { %767 = vmatpush1.bf16.msra.mxu0 (!%p462_p2), %v2218_v4  ;;  %916 = vmatpush1.bf16.msra.mxu1 (!%p462_p2), %v2248_v12  ;;  %v2230_v16 = vld [vmem:[%s2947_s3 + $0x50] ss:$8 sps:$4 sm:$0xff] (!%p462_p2)   ;;  %v2258_v18 = vld [vmem:[%s2949_s5 + $0x24] ss:$8 sps:$4 sm:$0xff] (!%p462_p2)   ;;  %v2260_v19 = vld [vmem:[%s2949_s5 + $0x20] ss:$8 sps:$4 sm:$0xff] (!%p462_p2)  }
   0xc   : > { %768 = vmatprep.subr.bf16.mxu0 (!%p462_p2), %v2219_v5  ;;  %917 = vmatprep.subr.bf16.mxu1 (!%p462_p2), %v2252_v14  ;;  %v2233_v20 = vld [vmem:[%s2947_s3 + $0x60] ss:$8 sps:$4 sm:$0xff] (!%p462_p2)   ;;  %v2264_v21 = vld [vmem:[%s2949_s5 + $0x34] ss:$8 sps:$4 sm:$0xff] (!%p462_p2)   ;;  %v2266_v23 = vld [vmem:[%s2949_s5 + $0x30] ss:$8 sps:$4 sm:$0xff] (!%p462_p2)  }
   0xd   : > { %s2963_s25 = smov (!%p522_p3, %s1930_s25), 7  ;;  %v2234_v22 = vld [vmem:[%s2947_s3 + $0x74] ss:$8 sps:$4 sm:$0xff]   ;;  %v2236_v24 = vld [vmem:[%s2947_s3 + $0x70] ss:$8 sps:$4 sm:$0xff]   ;;  %v2289_v42 = vld [vmem:[%s2950_s6 + $0x40] sm:$0xff]  }
   0xe   : > { %s2069_s26 = sshll.u32 %s2963_s25, 3  ;;  %v2270_v25 = vld [vmem:[%s2949_s5 + $0x44] ss:$8 sps:$4 sm:$0xff]   ;;  %s2960_s24 = sshll.u32 %s2963_s25, 2  ;;  %v2272_v27 = vld [vmem:[%s2949_s5 + $0x40] ss:$8 sps:$4 sm:$0xff]  }
   0xf   : > { %769 = vmatpush1.bf16.msra.mxu0 %v2221_v6  ;;  %918 = vmatpush1.bf16.msra.mxu1 %v2254_v15  ;;  %s2575_s21 = scalar_lea.vmem %s2944_s0, %s2069_s26  ;;  %v2237_v26 = vld [vmem:[%s2947_s3 + $0x84] ss:$8 sps:$4 sm:$0xff]   ;;  %v2239_v29 = vld [vmem:[%s2947_s3 + $0x80] ss:$8 sps:$4 sm:$0xff]   ;;  %v2276_v30 = vld [vmem:[%s2949_s5 + $0x54] ss:$8 sps:$4 sm:$0xff]   ;;  %s532_s23 = scalar_lea.vmem %s2945_s1, %s2960_s24  ;;  %v584_v6 = vlaneseq }
  0x10   : > { %770 = vmatprep.subr.bf16.mxu0 %v2222_v7  ;;  %919 = vmatprep.subr.bf16.mxu1 %v2258_v18  ;;  %v2280_v28 = vld [vmem:[%s2575_s21 + $0x4] ss:$8 sps:$4 sm:$0xff]   ;;  %v2240_v31 = vld [vmem:[%s2947_s3 + $0x94] ss:$8 sps:$4 sm:$0xff]   ;;  %v2242_v32 = vld [vmem:[%s2947_s3 + $0x90] ss:$8 sps:$4 sm:$0xff]  }
  0x11   : > { %796 = vmatprep.mubr.bf16.mxu0 %v2280_v28  ;;  %v2281_v33 = vld [vmem:[%s2949_s5 + $0x50] ss:$8 sps:$4 sm:$0xff]   ;;  %v2282_v34 = vld [vmem:[%s2949_s5 + $0x64] ss:$8 sps:$4 sm:$0xff]   ;;  %v2245_v36 = vld [vmem:[%s2947_s3 + $0xa0] ss:$8 sps:$4 sm:$0xff]  }
  0x12   : > { %v2243_v35 = vld [vmem:[%s2947_s3 + $0xa4] ss:$8 sps:$4 sm:$0xff]   ;;  %v2284_v37 = vld [vmem:[%s2949_s5 + $0x60] ss:$8 sps:$4 sm:$0xff]   ;;  %v2285_v38 = vld [vmem:[%s2949_s5 + $0x74] ss:$8 sps:$4 sm:$0xff]  }
  0x13   : > { %771 = vmatpush1.bf16.msra.mxu0 %v2224_v8  ;;  %920 = vmatpush1.bf16.msra.mxu1 %v2260_v19  ;;  %v2249_v39 = vld [vmem:[%s2947_s3 + $0xb4] ss:$8 sps:$4 sm:$0xff]   ;;  %v2287_v40 = vld [vmem:[%s2949_s5 + $0x70] ss:$8 sps:$4 sm:$0xff]   ;;  %v2255_v43 = vld [vmem:[%s2947_s3 + $0xc4] ss:$8 sps:$4 sm:$0xff]  }
  0x14   : > { %772 = vmatprep.subr.bf16.mxu0 %v2225_v9  ;;  %921 = vmatprep.subr.bf16.mxu1 %v2264_v21  ;;  %v2251_v41 = vld [vmem:[%s2947_s3 + $0xb0] ss:$8 sps:$4 sm:$0xff]   ;;  %v2288_v44 = vld [vmem:[%s532_s23] sm:$0xff]   ;;  %v2291_v47 = vld [vmem:[%s2950_s6 + $0x48] sm:$0xff]   ;;  %s2961_s30 = sshll.u32 %s2963_s25, 2  ;;  %v585_v9 = vshrl.u32 %v584_v6, 7 }
  0x15   : > { %v2290_v45 = vld [vmem:[%s2950_s6] sm:$0xff]   ;;  %v2261_v48 = vld [vmem:[%s2947_s3 + $0xd4] ss:$8 sps:$4 sm:$0xff]   ;;  %v2292_v49 = vld [vmem:[%s2950_s6 + $0x8] sm:$0xff]   ;;  %s2677_s17 = scalar_lea.vmem %s2946_s2, %s2961_s30  ;;  %vm2404_vm1 = vmmov 0   ;;  %s2070_s24 = sshll.u32 %s2963_s25, 4 }
  0x16   : > { %v2257_v46 = vld [vmem:[%s2947_s3 + $0xc0] ss:$8 sps:$4 sm:$0xff]   ;;  %v2263_v50 = vld [vmem:[%s2947_s3 + $0xd0] ss:$8 sps:$4 sm:$0xff]   ;;  %v2267_v52 = vld [vmem:[%s2947_s3 + $0xe4] ss:$8 sps:$4 sm:$0xff]  }
  0x17   : > { %773 = vmatpush1.bf16.msra.mxu0 %v2227_v10  ;;  %922 = vmatpush1.bf16.msra.mxu1 %v2266_v23  ;;  %v2293_v51 = vld [vmem:[%s2950_s6 + $0x50] sm:$0xff]   ;;  %v2269_v54 = vld [vmem:[%s2947_s3 + $0xe0] ss:$8 sps:$4 sm:$0xff]   ;;  %v2295_v58 = vld [vmem:[%s2950_s6 + $0x58] sm:$0xff]   ;;  %v586_v10 = vsub.s32 0, %v585_v9  ;;  %v590_v12 = vsub.s32 1, %v585_v9 }
  0x18   : > { %774 = vmatprep.subr.bf16.mxu0 %v2228_v13  ;;  %923 = vmatprep.subr.bf16.mxu1 %v2270_v25  ;;  %v2294_v53 = vld [vmem:[%s2950_s6 + $0x10] sm:$0xff]   ;;  %v2278_v57 = vld [vmem:[%s2575_s21] ss:$8 sps:$4 sm:$0xff]   ;;  %v2296_v59 = vld [vmem:[%s2950_s6 + $0x18] sm:$0xff]  }
  0x19   : > { %v2273_v55 = vld [vmem:[%s2947_s3 + $0xf4] ss:$8 sps:$4 sm:$0xff]   ;;  %v2275_v56 = vld [vmem:[%s2947_s3 + $0xf0] ss:$8 sps:$4 sm:$0xff]   ;;  %v2297_v60 = vld [vmem:[%s2950_s6 + $0x60] sm:$0xff]  }
  0x1a   : > { %v2298_v61 = vld [vmem:[%s2950_s6 + $0x20] sm:$0xff]   ;;  %v2299_v62 = vld [vmem:[%s2950_s6 + $0x68] sm:$0xff]   ;;  %v2301_v0 = vld [vmem:[%s2950_s6 + $0x70] sm:$0xff]  }
  0x1b   : > { %775 = vmatpush1.bf16.msra.mxu0 %v2230_v16  ;;  %924 = vmatpush1.bf16.msra.mxu1 %v2272_v27  ;;  %v2300_v63 = vld [vmem:[%s2950_s6 + $0x28] sm:$0xff]   ;;  %v2302_v1 = vld [vmem:[%s2950_s6 + $0x30] sm:$0xff]   ;;  %v2304_v3 = vld [vmem:[%s2950_s6 + $0x38] sm:$0xff]  }
  0x1c   : > { %776 = vmatprep.subr.bf16.mxu0 %v2231_v17  ;;  %925 = vmatprep.subr.bf16.mxu1 %v2276_v30  ;;  %v582_v11 = vld [vmem:[%s2948_s4] sm:$0x3]  ;;  %v2338_v9 = vld [vmem:[%s2952_s8 + $0x58] sm:$0xff]  }
  0x1d   : > { %v587_v13 = vrot.slane %v582_v11, %v586_v10  ;;  %v591_v14 = vrot.slane %v582_v11, %v590_v12  ;;  %v2339_v10 = vld [vmem:[%s2952_s8 + $0x18] sm:$0xff]   ;;  %v2341_v11 = vld [vmem:[%s2952_s8 + $0x60] sm:$0xff]  }
  0x1e   : > { %v2342_v12 = vld [vmem:[%s2952_s8 + $0x20] sm:$0xff]  }
  0x1f   : > { %777 = vmatpush1.bf16.msra.mxu0 %v2233_v20  ;;  %926 = vmatpush1.bf16.msra.mxu1 %v2281_v33  ;;  %v1134_v33 = vand.u32 127, %v584_v6  ;;  %v2333_v6 = vld [vmem:[%s2952_s8 + $0x8] sm:$0xff]  }
  0x20   : > { %778 = vmatprep.subr.bf16.mxu0 %v2234_v22  ;;  %927 = vmatprep.subr.bf16.mxu1 %v2282_v34 }
  0x21   : > { %vm1135_vm0 = vcmp.lt.s32.totalorder %v1134_v33, 5  ;;  %v2348_v33 = vld [vmem:[%s2952_s8 + $0x30] sm:$0xff]  }
  0x23   : > { %779 = vmatpush1.bf16.msra.mxu0 %v2236_v24  ;;  %928 = vmatpush1.bf16.msra.mxu1 %v2284_v37 }
  0x24   : > { %780 = vmatprep.subr.bf16.mxu0 %v2237_v26  ;;  %929 = vmatprep.subr.bf16.mxu1 %v2285_v38 }
  0x27   : > { %781 = vmatpush1.bf16.msra.mxu0 %v2239_v29  ;;  %930 = vmatpush1.bf16.msra.mxu1 %v2287_v40 }
  0x28   : > { %782 = vmatprep.subr.bf16.mxu0 %v2240_v31  ;;  %2071 = vmatprep.subr.bf16.mxu1 %v2289_v42  ;;  %v2305_v42 = vld [vmem:[%s2951_s7] ss:$8 sps:$4 sm:$0xff]  }
  0x2a   : > { %948 = vmatmul.mubr.bf16.vlgmr.msra.gmra.mrb[0].mxu1 %v2288_v44  ;;  %v2310_v44 = vld [vmem:[%s2951_s7 + $0x14] ss:$8 sps:$4 sm:$0xff]  }
  0x2b   : > { %783 = vmatpush1.bf16.msra.mxu0 %v2242_v32  ;;  %2072 = vmatpush3.bf16.msra.mxu1 %v2290_v45  ;;  %v2308_v45 = vld [vmem:[%s2951_s7 + $0x10] ss:$8 sps:$4 sm:$0xff]  }
  0x2c   : > { %784 = vmatprep.subr.bf16.mxu0 %v2243_v35  ;;  %2073 = vmatprep.subr.bf16.mxu1 %v2291_v47  ;;  %v2311_v47 = vld [vmem:[%s2951_s7 + $0x20] ss:$8 sps:$4 sm:$0xff]  }
  0x2f   : > { %785 = vmatpush1.bf16.msra.mxu0 %v2245_v36  ;;  %2074 = vmatpush3.bf16.msra.mxu1 %v2292_v49  ;;  %v2314_v49 = vld [vmem:[%s2951_s7 + $0x30] ss:$8 sps:$4 sm:$0xff]  }
  0x30   : > { %786 = vmatprep.subr.bf16.mxu0 %v2249_v39  ;;  %2075 = vmatprep.subr.bf16.mxu1 %v2293_v51 }
  0x33   : > { %787 = vmatpush1.bf16.msra.mxu0 %v2251_v41  ;;  %2076 = vmatpush3.bf16.msra.mxu1 %v2294_v53 }
  0x34   : > { %788 = vmatprep.subr.bf16.mxu0 %v2255_v43  ;;  %2077 = vmatprep.subr.bf16.mxu1 %v2295_v58  ;;  %v2307_v43 = vld [vmem:[%s2951_s7 + $0x4] ss:$8 sps:$4 sm:$0xff]   ;;  %v2317_v58 = vld [vmem:[%s2951_s7 + $0x40] ss:$8 sps:$4 sm:$0xff]  }
  0x37   : > { %789 = vmatpush1.bf16.msra.mxu0 %v2257_v46  ;;  %2078 = vmatpush3.bf16.msra.mxu1 %v2296_v59  ;;  %v2313_v46 = vld [vmem:[%s2951_s7 + $0x24] ss:$8 sps:$4 sm:$0xff]  }
  0x38   : > { %790 = vmatprep.subr.bf16.mxu0 %v2261_v48  ;;  %2079 = vmatprep.subr.bf16.mxu1 %v2297_v60  ;;  %v2316_v48 = vld [vmem:[%s2951_s7 + $0x34] ss:$8 sps:$4 sm:$0xff]   ;;  %v2319_v59 = vld [vmem:[%s2951_s7 + $0x44] ss:$8 sps:$4 sm:$0xff]   ;;  %v2320_v60 = vld [vmem:[%s2951_s7 + $0x50] ss:$8 sps:$4 sm:$0xff]  }
  0x3b   : > { %791 = vmatpush1.bf16.msra.mxu0 %v2263_v50  ;;  %2080 = vmatpush3.bf16.msra.mxu1 %v2298_v61  ;;  %v2322_v61 = vld [vmem:[%s2951_s7 + $0x54] ss:$8 sps:$4 sm:$0xff]  }
  0x3c   : > { %792 = vmatprep.subr.bf16.mxu0 %v2267_v52  ;;  %2081 = vmatprep.subr.bf16.mxu1 %v2299_v62  ;;  %v2325_v62 = vld [vmem:[%s2951_s7 + $0x64] ss:$8 sps:$4 sm:$0xff]  }
  0x3f   : > { %793 = vmatpush1.bf16.msra.mxu0 %v2269_v54  ;;  %2082 = vmatpush3.bf16.msra.mxu1 %v2300_v63  ;;  %v2323_v63 = vld [vmem:[%s2951_s7 + $0x60] ss:$8 sps:$4 sm:$0xff]  }
  0x40   : > { %794 = vmatprep.subr.bf16.mxu0 %v2273_v55  ;;  %2083 = vmatprep.subr.bf16.mxu1 %v2301_v0  ;;  %v2328_v0 = vld [vmem:[%s2951_s7 + $0x74] ss:$8 sps:$4 sm:$0xff]  }
  0x43   : > { %795 = vmatpush1.bf16.msra.mxu0 %v2275_v56  ;;  %2084 = vmatpush3.bf16.msra.mxu1 %v2302_v1  ;;  %v2326_v1 = vld [vmem:[%s2951_s7 + $0x70] ss:$8 sps:$4 sm:$0xff]  }
  0x44   : > { %1253 = vmatprep.subr.bf16.mxu0 %v2307_v43 }
  0x46   : > { %797 = vmatmul.mubr.bf16.vlgmr.msra.gmra.mrb[0].mxu0 %v2278_v57 }
  0x47   : > { %1285 = vmatprep.mubr.bf16.mxu0 %v2402_v2  ;;  %v2303_v2 = vld [vmem:[%s2950_s6 + $0x78] sm:$0xff]   ;;  %1254 = vmatpush1.bf16.msra.mxu0 %v2305_v42 }
  0x48   : > { %2085 = vmatprep.subr.bf16.mxu1 %v2303_v2  ;;  %1255 = vmatprep.subr.bf16.mxu0 %v2310_v44  ;;  %v2329_v2 = vld [vmem:[%s2952_s8 + $0x40] sm:$0xff]  }
  0x49   : > { %2086 = vmatpush3.bf16.msra.mxu1 %v2304_v3  ;;  %v2330_v3 = vld [vmem:[%s2952_s8] sm:$0xff]  }
  0x4a   : > { %2093 = vmatprep.subr.bf16.mxu1 %v2329_v2 }
  0x4b   : > { %1256 = vmatpush1.bf16.msra.mxu0 %v2308_v45 }
  0x4c   : > { %1257 = vmatprep.subr.bf16.mxu0 %v2313_v46 }
  0x4f   : > { %1258 = vmatpush1.bf16.msra.mxu0 %v2311_v47 }
  0x50   : > { %1259 = vmatprep.subr.bf16.mxu0 %v2316_v48 }
  0x53   : > { %1260 = vmatpush1.bf16.msra.mxu0 %v2314_v49  ;;  %v2354_v49 = vld [vmem:[%s2955_s11] sm:$0xff]  }
  0x54   : > { %1261 = vmatprep.subr.bf16.mxu0 %v2319_v59 }
  0x57   : > { %1262 = vmatpush1.bf16.msra.mxu0 %v2317_v58 }
  0x58   : > { %1263 = vmatprep.subr.bf16.mxu0 %v2322_v61  ;;  %v2048_v61 = vld [vmem:[%s2954_s10] ss:$0 sm:$0xff] }
  0x5b   : > { %1264 = vmatpush1.bf16.msra.mxu0 %v2320_v60 }
  0x5c   : > { %1265 = vmatprep.subr.bf16.mxu0 %v2325_v62 }
  0x5f   : > { %1266 = vmatpush1.bf16.msra.mxu0 %v2323_v63 }
  0x60   : > { %1267 = vmatprep.subr.bf16.mxu0 %v2328_v0 }
  0x63   : > { %1268 = vmatpush1.bf16.msra.mxu0 %v2326_v1 }
  0xfd   : > { %v949_v4 = vpop.f32.mrb[0].mxu1 }
  0xfe   : > { %v951_v5 = vpop.f32.mrb[1].mxu1 }
  0xff   : > { %v953_v7 = vpop.f32.mrb[2].mxu1 }
 0x100   : > { %v955_v8 = vpop.f32.mrb[3].mxu1 }
 0x119   : > { %v798_v15 = vpop.f32.mrb[0].mxu0 }
 0x11a   : > { %v799_v16 = vadd.f32 %v798_v15, %v587_v13  ;;  %v800_v17 = vpop.f32.mrb[1].mxu0 }
 0x11b   : > { %v801_v18 = vadd.f32 %v800_v17, %v591_v14  ;;  %v802_v19 = vpop.f32.mrb[2].mxu0 }
 0x11c   : > { %2370 = vtanh.f32 %v799_v16  ;;  %v803_v20 = vadd.f32 %v802_v19, %v587_v13  ;;  %v804_v21 = vpop.f32.mrb[3].mxu0  ;;  %v2344_v13 = vld [vmem:[%s2952_s8 + $0x68] sm:$0xff]  }
 0x11d   : > { %2372 = vtanh.f32 %v801_v18  ;;  %v805_v22 = vadd.f32 %v804_v21, %v591_v14  ;;  %v2345_v14 = vld [vmem:[%s2952_s8 + $0x28] sm:$0xff]   ;;  %v2331_v21 = vld [vmem:[%s2953_s9] sm:$0xff]  }
 0x11e   : > { %2374 = vtanh.f32 %v803_v20 }
 0x11f   : > { %2376 = vtanh.f32 %v805_v22 }
 0x126   : > { %v2713_v23 = vpop.eup %2370 }
 0x127   : > { %v2715_v24 = vpop.eup %2372  ;;  %v958_v27 = vmul.f32 %v2713_v23, %v949_v4  ;;  %v2403_v4 = vmov 0.0  }
 0x128   : > { %v2717_v25 = vpop.eup %2374  ;;  %v959_v29 = vmul.f32 %v2715_v24, %v951_v5  ;;  %2142 = vmatprep.subr.bf16.mxu0 %v2403_v4  ;;  %v2332_v5 = vld [vmem:[%s2952_s8 + $0x48] sm:$0xff]  }
 0x129   : > { %v2719_v26 = vpop.eup %2376  ;;  %v960_v28 = vmul.f32 %v2717_v25, %v953_v7  ;;  %v2335_v7 = vld [vmem:[%s2952_s8 + $0x50] sm:$0xff]  }
 0x12a   : > { %v961_v30 = vmul.f32 %v2719_v26, %v955_v8  ;;  %v2336_v8 = vld [vmem:[%s2952_s8 + $0x10] sm:$0xff]  }
 0x12b   : > { %v962_v31 = vpack.c.bf16 %v960_v28, %v958_v27  ;;  %v2334_v27 = vld [vmem:[%s2953_s9 + $0x8] sm:$0xff]   ;;  %v2337_v28 = vld [vmem:[%s2953_s9 + $0x10] sm:$0xff]  }
 0x12c   : > { %v963_v32 = vpack.c.bf16 %v961_v30, %v959_v29  ;;  %v2340_v29 = vld [vmem:[%s2953_s9 + $0x18] sm:$0xff]   ;;  %v2343_v30 = vld [vmem:[%s2953_s9 + $0x20] sm:$0xff]  }
 0x12e   : > { %1124 = vmatprep.mubr.bf16.mxu1 %v963_v32  ;;  %v2347_v32 = vld [vmem:[%s2952_s8 + $0x70] sm:$0xff]  }
 0x12f   : > { %1125 = vmatmul.mubr.bf16.vlgmr.msra.gmra.mrb[4].mxu1 %v962_v31  ;;  %v2346_v31 = vld [vmem:[%s2953_s9 + $0x28] sm:$0xff]  }
 0x130   : > { %2094 = vmatpush3.bf16.msra.mxu1 %v2330_v3 }
 0x131   : > { %2095 = vmatprep.subr.bf16.mxu1 %v2332_v5 }
 0x134   : > { %2096 = vmatpush3.bf16.msra.mxu1 %v2333_v6 }
 0x135   : > { %2097 = vmatprep.subr.bf16.mxu1 %v2335_v7 }
 0x138   : > { %2098 = vmatpush3.bf16.msra.mxu1 %v2336_v8  ;;  %v2049_v8 = vld [vmem:[%s2956_s12] ss:$0 sm:$0xff] }
 0x139   : > { %2099 = vmatprep.subr.bf16.mxu1 %v2338_v9 }
 0x13c   : > { %2100 = vmatpush3.bf16.msra.mxu1 %v2339_v10 }
 0x13d   : > { %2101 = vmatprep.subr.bf16.mxu1 %v2341_v11 }
 0x140   : > { %2102 = vmatpush3.bf16.msra.mxu1 %v2342_v12 }
 0x141   : > { %2103 = vmatprep.subr.bf16.mxu1 %v2344_v13 }
 0x144   : > { %2104 = vmatpush3.bf16.msra.mxu1 %v2345_v14 }
 0x145   : > { %2105 = vmatprep.subr.bf16.mxu1 %v2347_v32  ;;  %v2367_v32 = vld [vmem:[%s2957_s13 + $0x28] sm:$0xff]  }
 0x148   : > { %2106 = vmatpush3.bf16.msra.mxu1 %v2348_v33  ;;  %v2368_v33 = vld [vmem:[%s2957_s13 + $0x30] sm:$0xff]  }
 0x202   : > { %v2087_v34 = vpop.f32.mrb[4].mxu1 }
 0x203   : > { %v2088_v35 = vpop.f32.mrb[5].mxu1 }
 0x204   : > { %v2089_v36 = vadd.f32 %v2088_v35, %v2087_v34  ;;  %v2090_v37 = vpop.f32.mrb[6].mxu1  ;;  %v2349_v34 = vld [vmem:[%s2953_s9 + $0x30] sm:$0xff]   ;;  %v2350_v35 = vld [vmem:[%s2952_s8 + $0x78] sm:$0xff]  }
 0x205   : > { %v2091_v38 = vpop.f32.mrb[7].mxu1  ;;  %2107 = vmatprep.subr.bf16.mxu1 %v2350_v35 }
 0x206   : > { %v2092_v39 = vadd.f32 %v2091_v38, %v2090_v37  ;;  %v1136_v40 = vsel %vm1135_vm0, %v2089_v36, -1e+30  ;;  %v2351_v36 = vld [vmem:[%s2952_s8 + $0x38] sm:$0xff]   ;;  %v2353_v38 = vld [vmem:[%s2677_s17] sm:$0xff]   ;;  %s545_s17 = scalar_lea.vmem %s2959_s15, %s2070_s24 }
 0x207   : > { %1138 = vmax.xlane.f32.xlu0 %v1136_v40  ;;  %v2352_v37 = vld [vmem:[%s2953_s9 + $0x38] sm:$0xff]   ;;  %2108 = vmatpush3.bf16.msra.mxu1 %v2351_v36 }
 0x208   : > { %v1137_v41 = vsel %vm1135_vm0, %v2092_v39, -1e+30  ;;  %2162 = vmatprep.subr.bf16.mxu1 %v2403_v4 }
 0x20b   : > { %1140 = vmax.xlane.f32.xlu0 %v1137_v41 }
 0x294   : > { %v1139_v50 = vpop.xlane.xlu0 %1138 }
 0x295   : > { %v1142_v51 = vsub.f32 %v1136_v40, %v1139_v50 }
 0x297   : > { %v1144_v52 = vmul.f32 1.442695, %v1142_v51 }
 0x298   : > { %v1141_v53 = vpop.xlane.xlu0 %1140 }
 0x299   : > { %2378 = vpow2.f32 %v1144_v52  ;;  %v1143_v54 = vsub.f32 %v1137_v41, %v1141_v53  ;;  %v2359_v52 = vld [vmem:[%s2955_s11 + $0x28] sm:$0xff]  }
 0x29b   : > { %v1146_v55 = vmul.f32 1.442695, %v1143_v54 }
 0x29d   : > { %2380 = vpow2.f32 %v1146_v55  ;;  %v2360_v55 = vld [vmem:[%s2955_s11 + $0x30] sm:$0xff]  }
 0x2a3   : > { %v2379_v56 = vpop.eup %2378 }
 0x2a4   : > { %1148 = vadd.xlane.f32.xlu1 %v2379_v56 }
 0x2a7   : > { %v2381_v57 = vpop.eup %2380 }
 0x2a8   : > { %1150 = vadd.xlane.f32.xlu1 %v2381_v57 }
 0x331   : > { %v1149_v15 = vpop.xlane.xlu1 %1148 }
 0x332   : > { %2382 = vrcp.f32 %v1149_v15  ;;  %v2362_v15 = vld [vmem:[%s2957_s13] sm:$0xff]  }
 0x335   : > { %v1151_v16 = vpop.xlane.xlu1 %1150 }
 0x336   : > { %2384 = vrcp.f32 %v1151_v16  ;;  %v2363_v16 = vld [vmem:[%s2957_s13 + $0x8] sm:$0xff]  }
 0x33c   : > { %v2383_v17 = vpop.eup %2382 }
 0x33d   : > { %v1154_v19 = vmul.f32 %v2383_v17, %v2379_v56  ;;  %v2361_v56 = vld [vmem:[%s2955_s11 + $0x38] sm:$0xff]   ;;  %v2364_v17 = vld [vmem:[%s2957_s13 + $0x10] sm:$0xff]  }
 0x340   : > { %v2385_v18 = vpop.eup %2384 }
 0x341   : > { %v1155_v20 = vmul.f32 %v2385_v18, %v2381_v57  ;;  %v2365_v18 = vld [vmem:[%s2957_s13 + $0x18] sm:$0xff]  }
 0x343   : > { %v1156_v22 = vpack.c.bf16 %v1155_v20, %v1154_v19 }
 0x345   : > { %1286 = vmatmul.mubr.bf16.vlgmr.msra.gmra.mrb[4].mxu0 %v1156_v22 }
 0x346   : > { %2143 = vmatpush3.bf16.msra.mxu0 %v2331_v21  ;;  %2158 = vmatprep.mubr.msk.bf16.mxu0 %vm2404_vm1, %v2403_v4 }
 0x347   : > { %2144 = vmatprep.subr.bf16.mxu0 %v2403_v4 }
 0x34a   : > { %2145 = vmatpush3.bf16.msra.mxu0 %v2334_v27 }
 0x34b   : > { %2146 = vmatprep.subr.bf16.mxu0 %v2403_v4 }
 0x34e   : > { %2147 = vmatpush3.bf16.msra.mxu0 %v2337_v28 }
 0x34f   : > { %2148 = vmatprep.subr.bf16.mxu0 %v2403_v4 }
 0x352   : > { %2149 = vmatpush3.bf16.msra.mxu0 %v2340_v29 }
 0x353   : > { %2150 = vmatprep.subr.bf16.mxu0 %v2403_v4 }
 0x356   : > { %2151 = vmatpush3.bf16.msra.mxu0 %v2343_v30 }
 0x357   : > { %2152 = vmatprep.subr.bf16.mxu0 %v2403_v4 }
 0x35a   : > { %2153 = vmatpush3.bf16.msra.mxu0 %v2346_v31  ;;  %v2366_v31 = vld [vmem:[%s2957_s13 + $0x20] sm:$0xff]  }
 0x35b   : > { %2154 = vmatprep.subr.bf16.mxu0 %v2403_v4 }
 0x35e   : > { %2155 = vmatpush3.bf16.msra.mxu0 %v2349_v34  ;;  %v2369_v34 = vld [vmem:[%s2957_s13 + $0x38] sm:$0xff]  }
 0x35f   : > { %2156 = vmatprep.subr.bf16.mxu0 %v2403_v4 }
 0x362   : > { %2157 = vmatpush3.bf16.msra.mxu0 %v2352_v37 }
 0x363   : > { %2182 = vmatprep.subr.bf16.mxu0 %v2403_v4 }
 0x365   : > { %2159 = vmatmul.mubr.bf16.vlgmr.msra.gmra.mrb[8].mxu0 %v2353_v38 }
 0x366   : > { %2198 = vmatprep.mubr.msk.bf16.mxu0 %vm2404_vm1, %v2403_v4  ;;  %2183 = vmatpush3.bf16.msra.mxu0 %v2362_v15 }
 0x367   : > { %2184 = vmatprep.subr.bf16.mxu0 %v2403_v4 }
 0x36a   : > { %2185 = vmatpush3.bf16.msra.mxu0 %v2363_v16 }
 0x36b   : > { %2186 = vmatprep.subr.bf16.mxu0 %v2403_v4 }
 0x36e   : > { %2187 = vmatpush3.bf16.msra.mxu0 %v2364_v17 }
 0x36f   : > { %2188 = vmatprep.subr.bf16.mxu0 %v2403_v4 }
 0x372   : > { %2189 = vmatpush3.bf16.msra.mxu0 %v2365_v18 }
 0x373   : > { %2190 = vmatprep.subr.bf16.mxu0 %v2403_v4 }
 0x376   : > { %2191 = vmatpush3.bf16.msra.mxu0 %v2366_v31 }
 0x377   : > { %2192 = vmatprep.subr.bf16.mxu0 %v2403_v4 }
 0x37a   : > { %2193 = vmatpush3.bf16.msra.mxu0 %v2367_v32 }
 0x37b   : > { %2194 = vmatprep.subr.bf16.mxu0 %v2403_v4 }
 0x37e   : > { %2195 = vmatpush3.bf16.msra.mxu0 %v2368_v33 }
 0x37f   : > { %2196 = vmatprep.subr.bf16.mxu0 %v2403_v4 }
 0x382   : > { %2197 = vmatpush3.bf16.msra.mxu0 %v2369_v34 }
 0x418   : > { %v1287_v39 = vpop.f32.mrb[4].mxu0 }
 0x419   : > { %v1289_v40 = vpop.f32.mrb[5].mxu0  ;;  %v1296_v42 = vmul.f32 %v2713_v23, %v1287_v39  ;;  %v2355_v23 = vld [vmem:[%s2955_s11 + $0x8] sm:$0xff]  }
 0x41a   : > { %v1291_v41 = vpop.f32.mrb[6].mxu0  ;;  %v1297_v45 = vmul.f32 %v2715_v24, %v1289_v40  ;;  %v2356_v24 = vld [vmem:[%s2955_s11 + $0x10] sm:$0xff]  }
 0x41b   : > { %v1298_v43 = vmul.f32 %v2717_v25, %v1291_v41  ;;  %v1293_v44 = vpop.f32.mrb[7].mxu0  ;;  %v2357_v25 = vld [vmem:[%s2955_s11 + $0x18] sm:$0xff]  }
 0x41c   : > { %v1299_v46 = vmul.f32 %v2719_v26, %v1293_v44  ;;  %v2358_v26 = vld [vmem:[%s2955_s11 + $0x20] sm:$0xff]  }
 0x41d   : > { %v1300_v47 = vpack.c.bf16 %v1298_v43, %v1296_v42 }
 0x41e   : > { %v1301_v48 = vpack.c.bf16 %v1299_v46, %v1297_v45 }
 0x420   : > { %1480 = vmatprep.mubr.bf16.mxu1 %v1301_v48 }
 0x421   : > { %1481 = vmatmul.mubr.bf16.vlgmr.msra.gmra.mrb[8].mxu1 %v1300_v47 }
 0x422   : > { %2163 = vmatpush3.bf16.msra.mxu1 %v2354_v49  ;;  %2178 = vmatprep.mubr.msk.bf16.mxu1 %vm2404_vm1, %v2403_v4 }
 0x423   : > { %2164 = vmatprep.subr.bf16.mxu1 %v2403_v4 }
 0x426   : > { %2165 = vmatpush3.bf16.msra.mxu1 %v2355_v23 }
 0x427   : > { %2166 = vmatprep.subr.bf16.mxu1 %v2403_v4 }
 0x42a   : > { %2167 = vmatpush3.bf16.msra.mxu1 %v2356_v24 }
 0x42b   : > { %2168 = vmatprep.subr.bf16.mxu1 %v2403_v4 }
 0x42e   : > { %2169 = vmatpush3.bf16.msra.mxu1 %v2357_v25 }
 0x42f   : > { %2170 = vmatprep.subr.bf16.mxu1 %v2403_v4 }
 0x432   : > { %2171 = vmatpush3.bf16.msra.mxu1 %v2358_v26 }
 0x433   : > { %2172 = vmatprep.subr.bf16.mxu1 %v2403_v4 }
 0x436   : > { %2173 = vmatpush3.bf16.msra.mxu1 %v2359_v52 }
 0x437   : > { %2174 = vmatprep.subr.bf16.mxu1 %v2403_v4 }
 0x438   : > { %v1577_v50 = vpop.f32.mrb[8].mxu0 }
 0x439   : > { %v2160_v51 = vpop.f32.mrb[9].mxu0 }
 0x43a   : > { %v1580_v53 = vpop.f32.mrb[10].mxu0  ;;  %2175 = vmatpush3.bf16.msra.mxu1 %v2360_v55 }
 0x43b   : > { %v2161_v54 = vpop.f32.mrb[11].mxu0  ;;  %2176 = vmatprep.subr.bf16.mxu1 %v2403_v4  ;;  %v2058_v4 = vld [vmem:[%s2958_s14] ss:$0 sm:$0xff] }
 0x43e   : > { %2177 = vmatpush3.bf16.msra.mxu1 %v2361_v56 }
 0x4f4   : > { %v2109_v57 = vpop.f32.mrb[8].mxu1 }
 0x4f5   : > { %v2110_v58 = vpop.f32.mrb[9].mxu1 }
 0x4f6   : > { %v2111_v59 = vadd.f32 %v2110_v58, %v2109_v57  ;;  %v2112_v60 = vpop.f32.mrb[10].mxu1 }
 0x4f7   : > { %v2113_v62 = vpop.f32.mrb[11].mxu1 }
 0x4f8   : > { %v1578_v63 = vadd.f32 %v2111_v59, %v1577_v50  ;;  %v2114_v0 = vadd.f32 %v2113_v62, %v2112_v60 }
 0x4fa   : > { %v1591_v1 = vadd.f32 %v2048_v61, %v1578_v63  ;;  %v1581_v2 = vadd.f32 %v2114_v0, %v1580_v53 }
 0x4fc   : > { %v1592_v3 = vadd.f32 %v2048_v61, %v1581_v2  ;;  %v1593_v5 = vmax.f32 %v1591_v1, 0.0 }
 0x4fe   : > { %v1594_v6 = vmax.f32 %v1592_v3, 0.0 }
 0x500   : > { %v1595_v7 = vpack.c.bf16 %v1594_v6, %v1593_v5 }
 0x502   : > { %2179 = vmatmul.mubr.bf16.vlgmr.msra.gmra.mrb[12].mxu1 %v1595_v7 }
 0x5d5   : > { %v1701_v9 = vpop.f32.mrb[12].mxu1 }
 0x5d6   : > { %v1702_v10 = vadd.f32 %v2049_v8, %v1701_v9  ;;  %v2180_v11 = vpop.f32.mrb[13].mxu1 }
 0x5d7   : > { %v1704_v12 = vpop.f32.mrb[14].mxu1 }
 0x5d8   : > { %v1705_v13 = vadd.f32 %v2049_v8, %v1704_v12  ;;  %1708 = vmax.xlane.f32.xlu0 %v1702_v10  ;;  %v2181_v14 = vpop.f32.mrb[15].mxu1 }
 0x5da   : > { %1710 = vmax.xlane.f32.xlu1 %v1705_v13 }
 0x665   : > { %v1709_v19 = vpop.xlane.xlu0 %1708 }
 0x666   : > { %v1712_v20 = vsub.f32 %v1702_v10, %v1709_v19 }
 0x667   : > { %v1711_v21 = vpop.xlane.xlu1 %1710 }
 0x668   : > { %v1714_v22 = vmul.f32 1.442695, %v1712_v20  ;;  %v1713_v27 = vsub.f32 %v1705_v13, %v1711_v21 }
 0x66a   : > { %2386 = vpow2.f32 %v1714_v22  ;;  %v1716_v28 = vmul.f32 1.442695, %v1713_v27 }
 0x66c   : > { %2388 = vpow2.f32 %v1716_v28 }
 0x674   : > { %v2387_v29 = vpop.eup %2386 }
 0x675   : > { %1718 = vadd.xlane.f32.xlu0 %v2387_v29 }
 0x676   : > { %v2389_v30 = vpop.eup %2388 }
 0x677   : > { %1720 = vadd.xlane.f32.xlu1 %v2389_v30 }
 0x702   : > { %v1719_v35 = vpop.xlane.xlu0 %1718 }
 0x703   : > { %2390 = vrcp.f32 %v1719_v35 }
 0x704   : > { %v1721_v36 = vpop.xlane.xlu1 %1720 }
 0x705   : > { %2392 = vrcp.f32 %v1721_v36 }
 0x70d   : > { %v2391_v37 = vpop.eup %2390 }
 0x70e   : > { %v1723_v38 = vmul.f32 %v2391_v37, %v2387_v29 }
 0x70f   : > { %v2393_v39 = vpop.eup %2392 }
 0x710   : > { %v1725_v40 = vmul.f32 %v2393_v39, %v2389_v30  ;;  %1841 = vst [vmem:[%s545_s17 + $0x8] sm:$0xff] %v1723_v38 }
 0x712   : > { %v1726_v41 = vpack.c.bf16 %v1725_v40, %v1723_v38  ;;  %1842 = vst [vmem:[%s545_s17 + $0x18] sm:$0xff] %v1725_v40 }
 0x714   : > { %2199 = vmatmul.mubr.bf16.vlgmr.msra.gmra.mrb[12].mxu0 %v1726_v41 }
 0x7e7   : > { %v1832_v42 = vpop.f32.mrb[12].mxu0 }
 0x7e8   : > { %v1833_v43 = vadd.f32 %v2058_v4, %v1832_v42  ;;  %v2200_v44 = vpop.f32.mrb[13].mxu0 }
 0x7e9   : > { %v1835_v45 = vpop.f32.mrb[14].mxu0 }
 0x7ea   : > { %1839 = vst [vmem:[%s545_s17] sm:$0xff] %v1833_v43  ;;  %v1836_v46 = vadd.f32 %v2058_v4, %v1835_v45  ;;  %v2201_v47 = vpop.f32.mrb[15].mxu0 }
 0x7ec   : > { %1840 = vst [vmem:[%s545_s17 + $0x10] sm:$0xff] %v1836_v46 }
 0x7ed PF: > { %s25_s18 = sadd.s32 1, %s2400_s18  }
 0x7ee   : > { %p22_p4 = scmp.ge.s32.totalorder %s25_s18, 6  }
 0x7f0   :  { %24 = sbr.rel (!%p22_p4) target bundleno = 1 (0x1), region = 116 }

</bundles_post_ra>
